<compile_context>
chip_gen: v7x
topology: tpu7x:2x2x1
jax: 0.10.0
libtpu: 0.0.40
codegen_flags: <defaults>
</compile_context>

<pallas_src>
import jax
import jax.numpy as jnp
from jax.experimental import pallas as pl
from jax.experimental.pallas import tpu as pltpu


def sentence_embedding_kernel(x_ref, mask_ref, w_ref, b_ref, out_ref):
    """Masked mean pooling -> affine stand-in backbone -> L2 normalize.

    x_ref:    (TB, S, H) bfloat16  token embeddings (streamed; bf16 halves HBM bytes)
    mask_ref: (TB, S)    float32   attention mask (1.0 = real token), lane dim = S
    w_ref:    (H, H)     bfloat16  synthetic backbone projection weight (VMEM-resident)
    b_ref:    (1, H)     float32   synthetic backbone projection bias   (VMEM-resident)
    out_ref:  (TB, H)    float32   L2-normalized sentence embeddings
    """
    mask = mask_ref[...]                                              # (TB, S) f32

    # -- masked mean pooling FIRST (commutes exactly with the affine stand-in
    #    backbone, so a (TB,S,H) hidden tensor is never materialized):
    #      sum(tok * mask, dim=1) / clamp(sum(mask, dim=1), min=1e-9)
    #    Accumulate in f32; the bf16 stream is up-cast only here.
    x = x_ref[...].astype(jnp.float32)                                # (TB, S, H)
    summed = jnp.sum(x * mask[:, :, None], axis=1)                    # (TB, H)
    # TODO(synk): for very large S, chunk this reduction with an unrolled
    # lax.fori_loop over S-chunks accumulating a (TB,H) f32 partial, if the
    # VMEM/bundle report shows the tile-sized f32 temporary materializing.
    denom = jnp.maximum(jnp.sum(mask, axis=1, keepdims=True), 1e-9)   # (TB, 1)
    pooled = summed * pl.reciprocal(denom, approx=True)               # EUP, not VALU divide

    # -- synthetic backbone: one affine layer applied to the pooled vector.
    # TODO(synk): full MPNet transformer backbone not translated; stood in by a
    # single dense layer so the kernel exercises the MXU hot path.  With a real
    # (nonlinear) backbone, pooling must move back after the backbone.
    emb = jnp.dot(pooled.astype(jnp.bfloat16), w_ref[...],
                  preferred_element_type=jnp.float32) + b_ref[...]    # (TB, H)

    # -- F.normalize(emb, p=2, dim=1): emb / max(||emb||_2, 1e-12)
    #    rsqrt(max(||emb||^2, eps^2)) == 1 / max(||emb||, eps); rides the EUP.
    sq = jnp.sum(emb * emb, axis=1, keepdims=True)                    # (TB, 1)
    inv_norm = jax.lax.rsqrt(jnp.maximum(sq, 1e-24))
    out_ref[...] = (emb * inv_norm).astype(out_ref.dtype)


def _vmem_budget_bytes():
    """~75% of this core's VMEM, capped at 96 MiB (v7x -> ~48 MiB, v5e/v6e -> 96 MiB)."""
    try:
        cap = pltpu.get_tpu_info().vmem_capacity_bytes
    except Exception:
        cap = 64 * 1024 * 1024          # v7x per-TC floor -> safe on every generation
    return min(int(cap) * 3 // 4, 96 * 1024 * 1024)


def _pick_batch_tile(B, S, H, budget_bytes):
    """Largest batch tile whose double-buffered streams fit the VMEM budget."""
    per_row = S * H * 2 + S * 4 + H * 4          # x (bf16) + mask (f32) + out (f32), per buffer
    resident = H * H * 2 + H * 4                 # W (bf16) + b (f32): single-buffered
    avail = max(budget_bytes - resident, 2 * per_row)
    tb_cap = max(1, avail // (2 * per_row))      # 2 pipeline buffers per streamed operand
    tb_cap = int(min(tb_cap, 256, B))            # >256 rows: no further roofline benefit
    if B >= 16:                                  # keep >=2 grid steps (pipelining / 2 TCs)
        tb_cap = min(tb_cap, B // 2)
    # tile must divide B and (for the (8,128) layout rule) be a multiple of 8 or the full batch
    cands = [d for d in range(1, tb_cap + 1) if B % d == 0 and (d % 8 == 0 or d == B)]
    return max(cands) if cands else B


def _resident_spec(block_shape, index_map):
    """BlockSpec for grid-invariant operands: a 2nd pipeline buffer is wasted VMEM."""
    try:
        return pl.BlockSpec(block_shape, index_map, pipeline_mode=pl.Buffered(1))
    except Exception:  # jax version without pipeline_mode: fall back to default buffering
        return pl.BlockSpec(block_shape, index_map)


def sentence_embedding(token_embeddings, attention_mask, w, b, *, tb=None):
    """token_embeddings: (B,S,H), attention_mask: (B,S), w: (H,H), b: (H,)."""
    B, S, H = token_embeddings.shape
    assert H % 128 == 0, "pad hidden dim to a multiple of 128 for lane density"

    budget = _vmem_budget_bytes()
    if tb is None:
        tb = _pick_batch_tile(B, S, H, budget)
    assert B % tb == 0, "batch must be divisible by the batch tile"

    x_bf16 = token_embeddings.astype(jnp.bfloat16)        # stream the big tensor in bf16
    mask = attention_mask.astype(jnp.float32)             # (B, S): lane-dense, no (.,.,1) pad
    w_bf16 = w.astype(jnp.bfloat16)
    b2 = b.astype(jnp.float32).reshape(1, H)

    return pl.pallas_call(
        sentence_embedding_kernel,
        out_shape=jax.ShapeDtypeStruct((B, H), jnp.float32),
        grid_spec=pltpu.PrefetchScalarGridSpec(
            num_scalar_prefetch=0,
            grid=(B // tb,),                               # batch-tiled -> pipelined DMA
            in_specs=[
                pl.BlockSpec((tb, S, H), lambda i: (i, 0, 0)),
                pl.BlockSpec((tb, S), lambda i: (i, 0)),
                _resident_spec((H, H), lambda i: (0, 0)),  # weight stays VMEM-resident
                _resident_spec((1, H), lambda i: (0, 0)),  # bias stays VMEM-resident
            ],
            out_specs=pl.BlockSpec((tb, H), lambda i: (i, 0)),
        ),
        compiler_params=pltpu.CompilerParams(
            # TODO(synk): on v7x, if a profile shows one TensorCore idle, switch this
            # axis to pltpu.CORE_PARALLEL (and keep >=2 grid steps per core).
            dimension_semantics=("parallel",),
            vmem_limit_bytes=budget,                       # generation-aware cap
        ),
    )(x_bf16, mask, w_bf16, b2)


if __name__ == "__main__":
    B, S, H = 16, 8, 128      # small demo shapes; H multiple of 128 -> lane-dense stores
    key = jax.random.PRNGKey(0)
    k_x, k_w, k_b, k_m = jax.random.split(key, 4)

    token_embeddings = jax.random.normal(k_x, (B, S, H), dtype=jnp.float32)
    # deterministic synthetic backbone params
    w = jax.random.normal(k_w, (H, H), dtype=jnp.float32) * 0.05
    b = jax.random.normal(k_b, (H,), dtype=jnp.float32) * 0.01
    # attention mask: variable number of real tokens per sentence (>= 1 each)
    lengths = jax.random.randint(k_m, (B,), 1, S + 1)
    attention_mask = (jnp.arange(S)[None, :] < lengths[:, None]).astype(jnp.int32)

    out = sentence_embedding(token_embeddings, attention_mask, w, b)
    out = jax.block_until_ready(out)
    assert out.shape == (B, H)

    mask_f = attention_mask.astype(jnp.float32)[..., None]

    # Reference 1 (tight): same math as the kernel (bf16 token stream, pool-first,
    # bf16 matmul); tolerance only needs to cover the approximate EUP reciprocal.
    x_bf = token_embeddings.astype(jnp.bfloat16).astype(jnp.float32)
    pooled = jnp.sum(x_bf * mask_f, axis=1) / jnp.maximum(jnp.sum(mask_f, axis=1), 1e-9)
    emb = jnp.dot(pooled.astype(jnp.bfloat16), w.astype(jnp.bfloat16),
                  preferred_element_type=jnp.float32) + b[None, :]
    ref_kernel_math = emb / jnp.maximum(
        jnp.sqrt(jnp.sum(emb * emb, axis=1, keepdims=True)), 1e-12)
    assert jnp.allclose(out, ref_kernel_math, atol=2e-3, rtol=2e-3)

    # Reference 2 (module order, f32): backbone -> mean pool -> normalize, as in
    # the PyTorch forward.  Looser tolerance covers bf16 streaming + bf16 matmul.
    hid = jnp.einsum("bsh,hd->bsd", token_embeddings, w) + b[None, None, :]
    ref = jnp.sum(hid * mask_f, axis=1) / jnp.maximum(jnp.sum(mask_f, axis=1), 1e-9)
    ref = ref / jnp.maximum(
        jnp.sqrt(jnp.sum(ref * ref, axis=1, keepdims=True)), 1e-12)
    assert jnp.allclose(out, ref, atol=2e-2, rtol=2e-2)

    print("KERNEL_OK")
</pallas_src>

<mosaic_0001>
module attributes {stable_mosaic.version = 11 : i64} {
  func.func @sentence_embedding_kernel(%arg0: i32, %arg1: memref<8x8x128xbf16, #tpu.memory_space<vmem>>, %arg2: memref<8x8xf32, #tpu.memory_space<vmem>>, %arg3: memref<128x128xbf16, #tpu.memory_space<vmem>>, %arg4: memref<1x128xf32, #tpu.memory_space<vmem>>, %arg5: memref<8x128xf32, #tpu.memory_space<vmem>>) attributes {dimension_semantics = [#tpu.dimension_semantics<parallel>], iteration_bounds = array<i64: 2>, scalar_prefetch = 0 : i64, scratch_operands = 0 : i64, tpu.core_type = #tpu.core_type<tc>, window_params = [{transform_indices = @transform_0, window_bounds = array<i64: 8, 8, 128>}, {transform_indices = @transform_1, window_bounds = array<i64: 8, 8>}, {pipeline_mode = #tpu.pipeline_mode<synchronous>, transform_indices = @transform_2, window_bounds = array<i64: 128, 128>}, {pipeline_mode = #tpu.pipeline_mode<synchronous>, transform_indices = @transform_3, window_bounds = array<i64: 1, 128>}, {transform_indices = @transform_4, window_bounds = array<i64: 8, 128>}]} {
    %c0 = arith.constant 0 : index
    %c0_0 = arith.constant 0 : index
    %0 = vector.load %arg2[%c0, %c0_0] : memref<8x8xf32, #tpu.memory_space<vmem>>, vector<8x8xf32>
    %c0_1 = arith.constant 0 : index
    %c0_2 = arith.constant 0 : index
    %c0_3 = arith.constant 0 : index
    %1 = vector.load %arg1[%c0_1, %c0_2, %c0_3] : memref<8x8x128xbf16, #tpu.memory_space<vmem>>, vector<8x8x128xbf16>
    %2 = arith.extf %1 : vector<8x8x128xbf16> to vector<8x8x128xf32>
    %3 = vector.shape_cast %0 : vector<8x8xf32> to vector<8x8x1xf32>
    %4 = vector.broadcast %3 : vector<8x8x1xf32> to vector<8x8x128xf32>
    %5 = arith.mulf %2, %4 : vector<8x8x128xf32>
    %cst = arith.constant dense<0.000000e+00> : vector<8x128xf32>
    %6 = vector.multi_reduction <add>, %5, %cst [1] : vector<8x8x128xf32> to vector<8x128xf32>
    %cst_4 = arith.constant dense<0.000000e+00> : vector<8xf32>
    %7 = vector.multi_reduction <add>, %0, %cst_4 [1] : vector<8x8xf32> to vector<8xf32>
    %8 = vector.shape_cast %7 : vector<8xf32> to vector<8x1xf32>
    %cst_5 = arith.constant 9.99999971E-10 : f32
    %9 = vector.broadcast %cst_5 : f32 to vector<8x1xf32>
    %10 = arith.maximumf %8, %9 : vector<8x1xf32>
    %11 = tpu.reciprocal %10 {approx = true} : vector<8x1xf32> -> vector<8x1xf32>
    %12 = vector.broadcast %11 : vector<8x1xf32> to vector<8x128xf32>
    %13 = arith.mulf %6, %12 : vector<8x128xf32>
    %14 = arith.truncf %13 : vector<8x128xf32> to vector<8x128xbf16>
    %c0_6 = arith.constant 0 : index
    %c0_7 = arith.constant 0 : index
    %15 = vector.load %arg3[%c0_6, %c0_7] : memref<128x128xbf16, #tpu.memory_space<vmem>>, vector<128x128xbf16>
    %cst_8 = arith.constant dense<0.000000e+00> : vector<8x128xf32>
    %16 = tpu.matmul %14, %15, %cst_8 {dimension_numbers = #tpu.dot_dimension_numbers<[1], [0], [0], [1], [0, 0, 1, 1], [], []>} : vector<8x128xbf16>, vector<128x128xbf16>, vector<8x128xf32> -> vector<8x128xf32>
    %c0_9 = arith.constant 0 : index
    %c0_10 = arith.constant 0 : index
    %17 = vector.load %arg4[%c0_9, %c0_10] : memref<1x128xf32, #tpu.memory_space<vmem>>, vector<1x128xf32>
    %18 = vector.broadcast %17 : vector<1x128xf32> to vector<8x128xf32>
    %19 = arith.addf %16, %18 : vector<8x128xf32>
    %20 = arith.mulf %19, %19 : vector<8x128xf32>
    %cst_11 = arith.constant dense<0.000000e+00> : vector<8xf32>
    %21 = vector.multi_reduction <add>, %20, %cst_11 [1] : vector<8x128xf32> to vector<8xf32>
    %22 = vector.shape_cast %21 : vector<8xf32> to vector<8x1xf32>
    %cst_12 = arith.constant 1.000000e-24 : f32
    %23 = vector.broadcast %cst_12 : f32 to vector<8x1xf32>
    %24 = arith.maximumf %22, %23 : vector<8x1xf32>
    %25 = math.rsqrt %24 : vector<8x1xf32>
    %26 = vector.broadcast %25 : vector<8x1xf32> to vector<8x128xf32>
    %27 = arith.mulf %19, %26 : vector<8x128xf32>
    %c0_13 = arith.constant 0 : index
    %c0_14 = arith.constant 0 : index
    %28 = vector.load %arg5[%c0_13, %c0_14] : memref<8x128xf32, #tpu.memory_space<vmem>>, vector<8x128xf32>
    tpu.vector_store %arg5[%c0_13, %c0_14], %27 {strides = array<i32>} : memref<8x128xf32, #tpu.memory_space<vmem>>, vector<8x128xf32>,
    return
  }
  func.func @transform_0(%arg0: i32) -> (i32, i32, i32) {
    %c0_i32 = arith.constant 0 : i32
    %c0_i32_0 = arith.constant 0 : i32
    %c0_i32_1 = arith.constant 0 : i32
    return %arg0, %c0_i32, %c0_i32_0 : i32, i32, i32
  }
  func.func @transform_1(%arg0: i32) -> (i32, i32) {
    %c0_i32 = arith.constant 0 : i32
    %c0_i32_0 = arith.constant 0 : i32
    return %arg0, %c0_i32 : i32, i32
  }
  func.func @transform_2(%arg0: i32) -> (i32, i32) {
    %c0_i32 = arith.constant 0 : i32
    %c0_i32_0 = arith.constant 0 : i32
    %c0_i32_1 = arith.constant 0 : i32
    return %c0_i32, %c0_i32_0 : i32, i32
  }
  func.func @transform_3(%arg0: i32) -> (i32, i32) {
    %c0_i32 = arith.constant 0 : i32
    %c0_i32_0 = arith.constant 0 : i32
    %c0_i32_1 = arith.constant 0 : i32
    return %c0_i32, %c0_i32_0 : i32, i32
  }
  func.func @transform_4(%arg0: i32) -> (i32, i32) {
    %c0_i32 = arith.constant 0 : i32
    %c0_i32_0 = arith.constant 0 : i32
    return %arg0, %c0_i32 : i32, i32
  }
}

</mosaic_0001>

<bundles_post_ra>
// kernel: tpu_custom_call.1
= control target key start
LH: loop header
LB: loop body
LE: loop exit
PB: predicated region body
PF: predicated region fallthrough
CT: control target
= control target key end

     0   :  { %9 = vsyncpa [#allocation3], 0  ;;  %s1209_s0 = inlined_call_operand.hbm [shape: bf16[16,8,128], index: 0, kind: input, shape index: {}]   ;;  %s1210_s1 = inlined_call_operand.vmem [shape: f32[16,8], index: 1, kind: input, shape index: {}]   ;;  %s1211_s2 = inlined_call_operand.hbm [shape: bf16[128,128], index: 2, kind: input, shape index: {}]   ;;  %s1212_s3 = inlined_call_operand.vmem [shape: f32[1,128], index: 3, kind: input, shape index: {}]   ;;  %s1213_s4 = inlined_call_operand.hbm [shape: f32[16,128], index: 4, kind: output, shape index: {}]  }
   0x1   :  { %11 = vsyncpa [#allocation3 + $0x1], 0 }
   0x2   :  { %12 = vsyncpa [#allocation6], 0 }
   0x3   :  { %13 = vsyncpa [#allocation4], 0 }
   0x4   :  { %15 = vsyncpa [#allocation4 + $0x1], 0  ;;  %s989_s15 = smov 0   ;;  %s991_s16 = smov 0  }
   0x5   :  { %s993_s17 = smov 0   ;;  %s995_s18 = smov 0  }
   0x6 LB: > { %s1010_s19 = sadd.s32 4294967295, %s955_s18   ;;  %s680_s20 = sadd.s32 4294967294, %s955_s18   ;;  %s955_s18 = sphi %s995_s18, %s1233_s18   ;;  %s951_s17 = sphi %s993_s17, %s1232_s17   ;;  %s947_s16 = sphi %s991_s16, %s1231_s16   ;;  %s943_s15 = sphi %s989_s15, %s1230_s15  }
   0x7   : > { %p41_p0 = scmp.ne.s32.totalorder %s947_s16, %s943_s15  ;;  %p1214_p1 = scmp.eq.s32.totalorder %s1010_s19, 0 }
   0x8   : > { %p139_p3 = scmp.eq.s32.totalorder %s680_s20, 1  ;;  %p681_p5 = scmp.ge.s32.totalorder %s955_s18, 1 }
   0x9   : > { %p1019_p4 = por %p1214_p1, %p41_p0  ;;  %p146_p7 = scmp.lt.s32.totalorder %s955_s18, 3 }
   0xa   : > { %p1024_p6 = por %p139_p3, %p41_p0  ;;  %s957_s24 = smov [#allocation5]  }
   0xb   : > { %s1217_s21 = scalar_select %p1019_p4, 1, 0 }
   0xc   : > { %s1218_s22 = scalar_select %p1024_p6, 1, 0 }
   0xd   : > { %p1029_p8 = pnand %p681_p5, %p146_p7  ;;  %s158_s25 = sshll.u32 %s957_s24, 4  ;;  %s1033_s25 = int_to_ptr.vmem [resolvable:$true] %s158_s25 }
   0xe   : > { %s1045_s27 = sadd.s32 1, %s955_s18   ;;  %s28_s28 = sadd.s32 1, %s951_s17 }
   0xf   : > { %s1219_s23 = scalar_select %p1029_p8, 1, 0 }
  0x10   : > { %p762_p9 = pneg %p1029_p8  ;;  %s25_s29 = ssub.s32 %s955_s18, %s1045_s27 }
  0x11   : > { %s827_s6 = scalar_lea.hbm %s1211_s2, 1024 }
  0x12   : > { %p1040_p11 = pnand %p762_p9, %p1214_p1  ;;  %p828_p12 = scmp.ne.s32.totalorder %s1211_s2, %s827_s6 }
  0x13   : > { %p834_p5 = scmp.lt.u32.totalorder %s827_s6, %s1211_s2 }
  0x14   : > { %p829_p13 = pneg %p1040_p11 }
  0x16   : > { %p830_p0 = pnand %p829_p13, %p828_p12 }
  0x18   : > { %p831_p3 = pneg %p830_p0 }
  0x1a   : > { %p836_p7 = pnand %p834_p5, %p831_p3 }
  0x1c   : > { %839 = shalt.err (!%p836_p7)
}
  0x1d   : > { %s840_s11 = scalar_lea.vmem %s1033_s25, 1024  ;;  %p848_p2 = scmp.lt.s32.totalorder %s1033_s25, %s1033_s25 }
  0x1e   : > { %p841_p9 = scmp.ne.s32.totalorder %s1033_s25, %s840_s11  ;;  %p849_p6 = scmp.lt.s32.totalorder %s840_s11, %s840_s11 }
  0x20   : > { %p843_p10 = pnand %p841_p9, %p829_p13  ;;  %p850_p4 = por %p849_p6, %p848_p2 }
  0x22   : > { %p844_p1 = pneg %p843_p10 }
  0x24   : > { %p851_p8 = pnand %p850_p4, %p844_p1 }
  0x26   : > { %854 = shalt.err (!%p851_p8)
}
  0x27   : > { %s958_s12 = smov 64   ;;  %s959_s13 = smov 4  }
  0x28   : > { %765 = dma.hbm_to_vmem [thread:$0]  (!%p1040_p11), %s1211_s2, 1024, %s1033_s25, [#allocation6], %s958_s12, %s958_s12, %s959_s13  }
  0x29   : > { %p26_p1 = scmp.eq.s32.totalorder %s25_s29, 0  ;;  %p35_p2 = scmp.ne.s32.totalorder %s951_s17, %s947_s16 }
  0x2a   : > { %p36_p4 = scmp.eq.s32.totalorder %s955_s18, 0  ;;  %p775_p6 = scmp.lt.s32.totalorder %s955_s18, 2 }
  0x2b   : > { %s1079_s24 = scalar_select %p26_p1, %s951_s17, %s28_s28  }
  0x2c   : > { %p37_p8 = por %p36_p4, %p35_p2  ;;  %p1221_p10 = scmp.eq.s32.totalorder %s1010_s19, 1 }
  0x2d   : > { %s175_s26 = sand.u32 1, %s951_s17   ;;  %s705_s5 = sshll.u32 %s955_s18, 9 }
  0x2e   : > { %p1083_p12 = por %p1221_p10, %p35_p2  ;;  %s684_s6 = sshll.u32 %s175_s26, 5 }
  0x2f   : > { %s1092_s9 = scalar_lea.hbm %s1209_s0, %s705_s5  ;;  %s179_s25 = scalar_lea.vmem [#allocation2], %s684_s6 }
  0x30   : > { %s186_s28 = sshll.u32 %s179_s25, 4  ;;  %p1094_p11 = pnand %p775_p6, %p37_p8  ;;  %s1098_s28 = int_to_ptr.vmem [resolvable:$true] %s186_s28 }
  0x31   : > { %s1100_s10 = scalar_lea.sflag [#allocation3], %s175_s26  ;;  %s855_s11 = scalar_lea.hbm %s1092_s9, 512 }
  0x32   : > { %p856_p13 = scmp.ne.s32.totalorder %s1092_s9, %s855_s11  ;;  %p857_p0 = pneg %p1094_p11 }
  0x33   : > { %s860_s5 = scalar_lea.hbm %s1209_s0, 1024  ;;  %p861_p7 = scmp.lt.u32.totalorder %s1092_s9, %s1209_s0 }
  0x34   : > { %p858_p3 = pnand %p857_p0, %p856_p13  ;;  %p862_p9 = scmp.lt.u32.totalorder %s860_s5, %s855_s11 }
  0x35   : > { %p864_p2 = scmp.lt.u32.totalorder %s855_s11, %s1092_s9 }
  0x36   : > { %p859_p5 = pneg %p858_p3  ;;  %p863_p1 = por %p862_p9, %p861_p7 }
  0x38   : > { %p865_p4 = por %p864_p2, %p863_p1 }
  0x3a   : > { %p866_p6 = pnand %p865_p4, %p859_p5 }
  0x3c   : > { %869 = shalt.err (!%p866_p6)
}
  0x3d   : > { %s870_s26 = scalar_lea.vmem %s1098_s28, 512  ;;  %s960_s8 = smov [#allocation2]  }
  0x3e   : > { %p871_p8 = scmp.ne.s32.totalorder %s1098_s28, %s870_s26  ;;  %s875_s25 = sshll.u32 %s960_s8, 4  ;;  %s876_s25 = int_to_ptr.vmem [resolvable:$false] %s875_s25 }
  0x3f   : > { %s877_s14 = scalar_lea.vmem %s876_s25, 1024  ;;  %p878_p3 = scmp.lt.s32.totalorder %s1098_s28, %s876_s25 }
  0x40   : > { %p873_p10 = pnand %p871_p8, %p857_p0  ;;  %p879_p7 = scmp.lt.s32.totalorder %s877_s14, %s870_s26 }
  0x42   : > { %p874_p13 = pneg %p873_p10  ;;  %p880_p9 = por %p879_p7, %p878_p3 }
  0x44   : > { %p881_p1 = pnand %p880_p9, %p874_p13 }
  0x46   : > { %884 = shalt.err (!%p881_p1)
}
  0x47   : > { %769 = dma.hbm_to_vmem [thread:$0]  (!%p1094_p11), %s1092_s9, 512, %s1098_s28, %s1100_s10, %s958_s12, %s958_s12, %s959_s13  }
  0x48   : > { %p1224_p0 = scmp.ne.s32.totalorder %s1219_s23, 0 }
  0x49   : > { %s1134_s11 = sand.u32 (!%p1224_p0), 1, %s947_s16   ;;  %p1225_p5 = scmp.ne.s32.totalorder (!%p1224_p0), %s1217_s21, 0 }
  0x4a   : > { %205 = sbr.rel (%p1224_p0) target bundleno = 657 (0x291), region = 36  ;;  %s688_s20 = sshll.u32 (!%p1224_p0), %s1134_s11, 5 }
  0x4b   : > { %s208_s5 = scalar_lea.sflag (!%p1224_p0), [#allocation3], %s1134_s11  ;;  %s1138_s6 = scalar_lea.vmem (!%p1224_p0), [#allocation2], %s688_s20 }
  0x51   : > { %930 = dma.done.wait (%p1225_p5), %s208_s5, 512  }
  0x52   : > { %932 = vsyncadd (%p1225_p5), %s208_s5, 4294966784  ;;  %p1226_p11 = scmp.eq.s32.totalorder %s1010_s19, 0 }
  0x54   : > { %934 = dma.done.wait (%p1226_p11), [#allocation6], 1024   ;;  %p1227_p2 = pmov %p1226_p11 }
  0x55   : > { %p245_p4 = scmp.lt.s32.totalorder %s1010_s19, 1  ;;  %v267_v0 = vlaneseq  ;;  %vm379_vm0 = vcmask 64512   ;;  %v815_v16 = vld [vmem:[#allocation5] sm:$0xff]   ;;  %v961_v19 = vmov 0.0   ;;  %v816_v21 = vld [vmem:[#allocation5 + $0x8] sm:$0xff]   ;;  %v817_v23 = vld [vmem:[#allocation5 + $0x10] sm:$0xff]  }
  0x56   : > { %936 = vsyncadd (%p1227_p2), [#allocation6], 4294966272  ;;  %734 = vmatprep.subr.bf16.mxu0 %v961_v19  ;;  %v818_v24 = vld [vmem:[#allocation5 + $0x18] sm:$0xff]   ;;  %v819_v25 = vld [vmem:[#allocation5 + $0x20] sm:$0xff]   ;;  %vm962_vm1 = vmmov 0   ;;  %vm457_vm2 = vcmask 1041409  }
  0x57   : > { %s246_s23 = scalar_select %p245_p4, %s1010_s19, 1  ;;  %v268_v1 = vshrl.u32 %v267_v0, 7  ;;  %735 = vmatpush3.bf16.msra.mxu0 %v815_v16  ;;  %v820_v26 = vld [vmem:[#allocation5 + $0x28] sm:$0xff]   ;;  %v821_v27 = vld [vmem:[#allocation5 + $0x30] sm:$0xff]   ;;  %750 = vmatprep.mubr.msk.bf16.mxu0 %vm962_vm1, %v961_v19  ;;  %v822_v28 = vld [vmem:[#allocation5 + $0x38] sm:$0xff]   ;;  %vm460_vm3 = vcmask 1042434  }
  0x58   : > { %736 = vmatprep.subr.bf16.mxu0 %v961_v19  ;;  %v722_v31 = vld [vmem:[%s1138_s6 + $0x8] sm:$0xff]   ;;  %v707_v32 = vld [vmem:[%s1138_s6] sm:$0xff]   ;;  %v723_v34 = vld [vmem:[%s1138_s6 + $0x10] sm:$0xff]   ;;  %vm463_vm4 = vcmask 1043459   ;;  %vm466_vm5 = vcmask 1044484   ;;  %vm469_vm6 = vcmask 1045509  }
  0x59   : > { %s691_s12 = sshll.u32 %s246_s23, 3  ;;  %v283_v2 = vsub.s32 2, %v268_v1  ;;  %v269_v3 = vsub.s32 0, %v268_v1  ;;  %v290_v8 = vsub.s32 3, %v268_v1  ;;  %v297_v10 = vsub.s32 4, %v268_v1  ;;  %v724_v44 = vld [vmem:[%s1138_s6 + $0x18] sm:$0xff]  }
  0x5a   : > { %s248_s28 = scalar_lea.vmem %s1210_s1, %s691_s12  ;;  %v304_v12 = vsub.s32 5, %v268_v1  ;;  %v311_v14 = vsub.s32 6, %v268_v1  ;;  %v276_v15 = vsub.s32 1, %v268_v1  ;;  %v318_v18 = vsub.s32 7, %v268_v1  ;;  %s690_s10 = sshll.u32 %s1134_s11, 3 }
  0x5b   : > { %v250_v4 = vld [vmem:[%s248_s28] sm:$0xff]  ;;  %737 = vmatpush3.bf16.msra.mxu0 %v816_v21  ;;  %v712_v35 = vunpack.c.l.bf16 %v722_v31  ;;  %v708_v36 = vunpack.c.l.bf16 %v707_v32  ;;  %v713_v37 = vunpack.c.h.bf16 %v722_v31  ;;  %v716_v38 = vunpack.c.l.bf16 %v723_v34  ;;  %s702_s7 = sshll.u32 %s1010_s19, 7  ;;  %s243_s26 = scalar_lea.vmem [#allocation7], %s690_s10 }
  0x5c   : > { %v380_v5 = vsel %vm379_vm0, %v250_v4, 0.0  ;;  %v284_v6 = vrot.slane %v250_v4, %v283_v2  ;;  %v270_v7 = vrot.slane %v250_v4, %v269_v3  ;;  %v291_v9 = vrot.slane %v250_v4, %v290_v8  ;;  %738 = vmatprep.subr.bf16.mxu0 %v961_v19  ;;  %s588_s8 = sshll.u32 %s243_s26, 4  ;;  %s1165_s20 = scalar_lea.hbm %s1213_s4, %s702_s7  ;;  %s1167_s8 = int_to_ptr.vmem [resolvable:$true] %s588_s8 }
  0x5d   : > { %381 = vadd.xlane.f32.xlu0 %v380_v5  ;;  %v298_v11 = vrot.slane %v250_v4, %v297_v10  ;;  %v305_v13 = vrot.slane %v250_v4, %v304_v12  ;;  %v312_v17 = vrot.slane %v250_v4, %v311_v14  ;;  %v277_v20 = vrot.slane %v250_v4, %v276_v15  ;;  %s575_s5 = scalar_lea.sflag [#allocation4], %s1134_s11  ;;  %s885_s6 = scalar_lea.vmem %s1167_s8, 128 }
  0x5e   : > { %286 = vbcast.lane.b32.xlu1 %v284_v6, 256  ;;  %v319_v22 = vrot.slane %v250_v4, %v318_v18  ;;  %v717_v40 = vunpack.c.h.bf16 %v723_v34  ;;  %v720_v48 = vunpack.c.l.bf16 %v724_v44  ;;  %v721_v56 = vunpack.c.h.bf16 %v724_v44  ;;  %p886_p6 = scmp.ne.s32.totalorder %s1167_s8, %s885_s6  ;;  %s963_s19 = smov [#allocation7]  }
  0x5f   : > { %739 = vmatpush3.bf16.msra.mxu0 %v817_v23  ;;  %v709_v6 = vunpack.c.h.bf16 %v707_v32  ;;  %vm472_vm7 = vcmask 1046534   ;;  %vm475_vm8 = vcmask 1047559   ;;  %s889_s23 = sshll.u32 %s963_s19, 4  ;;  %s890_s23 = int_to_ptr.vmem [resolvable:$false] %s889_s23 }
  0x60   : > { %740 = vmatprep.subr.bf16.mxu0 %v961_v19  ;;  %p887_p8 = pnand %p886_p6, %p1083_p12  ;;  %s891_s12 = scalar_lea.vmem %s890_s23, 256 }
  0x61   : > { %p892_p13 = scmp.lt.s32.totalorder %s1167_s8, %s890_s23  ;;  %p893_p3 = scmp.lt.s32.totalorder %s891_s12, %s885_s6 }
  0x62   : > { %272 = vbcast.lane.b32.xlu1 %v270_v7, 256  ;;  %p888_p10 = pneg %p887_p8 }
  0x63   : > { %741 = vmatpush3.bf16.msra.mxu0 %v818_v24  ;;  %p894_p7 = por %p893_p3, %p892_p13 }
  0x64   : > { %742 = vmatprep.subr.bf16.mxu0 %v961_v19 }
  0x65   : > { %p895_p9 = pnand %p894_p7, %p888_p10 }
  0x66   : > { %293 = vbcast.lane.b32.xlu1 %v291_v9, 256 }
  0x67   : > { %743 = vmatpush3.bf16.msra.mxu0 %v819_v25 }
  0x68   : > { %744 = vmatprep.subr.bf16.mxu0 %v961_v19 }
  0x6a   : > { %300 = vbcast.lane.b32.xlu1 %v298_v11, 256 }
  0x6b   : > { %745 = vmatpush3.bf16.msra.mxu0 %v820_v26 }
  0x6c   : > { %746 = vmatprep.subr.bf16.mxu0 %v961_v19 }
  0x6e   : > { %307 = vbcast.lane.b32.xlu1 %v305_v13, 256 }
  0x6f   : > { %747 = vmatpush3.bf16.msra.mxu0 %v821_v27 }
  0x70   : > { %748 = vmatprep.subr.bf16.mxu0 %v961_v19 }
  0x72   : > { %314 = vbcast.lane.b32.xlu1 %v312_v17, 256 }
  0x73   : > { %279 = vbcast.lane.b32.xlu0 %v277_v20, 256  ;;  %749 = vmatpush3.bf16.msra.mxu0 %v822_v28 }
  0x76   : > { %321 = vbcast.lane.b32.xlu1 %v319_v22, 256 }
  0xd0   : > { %v287_v29 = vpop.permute.xlu1 %286 }
  0xd1   : > { %v325_v41 = vmul.f32 %v712_v35, %v287_v29 }
  0xd3   : > { %v343_v49 = vrot.slane %v325_v41, 4 }
  0xd4   : > { %v273_v30 = vpop.permute.xlu1 %272 }
  0xd5   : > { %v323_v42 = vmul.f32 %v708_v36, %v273_v30  ;;  %v344_v57 = vadd.f32 %v343_v49, %v325_v41 }
  0xd7   : > { %v331_v50 = vrot.slane %v323_v42, 4  ;;  %v345_v2 = vrot.slane %v344_v57, 2 }
  0xd8   : > { %v294_v33 = vpop.permute.xlu1 %293 }
  0xd9   : > { %v326_v43 = vmul.f32 %v713_v37, %v294_v33  ;;  %v332_v58 = vadd.f32 %v331_v50, %v323_v42  ;;  %v346_v13 = vadd.f32 %v345_v2, %v344_v57 }
  0xdb   : > { %v349_v51 = vrot.slane %v326_v43, 4  ;;  %v333_v3 = vrot.slane %v332_v58, 2  ;;  %v347_v24 = vrot.slane %v346_v13, 1 }
  0xdc   : > { %v301_v39 = vpop.permute.xlu1 %300 }
  0xdd   : > { %v327_v45 = vmul.f32 %v716_v38, %v301_v39  ;;  %v350_v59 = vadd.f32 %v349_v51, %v326_v43  ;;  %v334_v14 = vadd.f32 %v333_v3, %v332_v58  ;;  %v348_v33 = vadd.f32 %v347_v24, %v346_v13 }
  0xdf   : > { %v355_v52 = vrot.slane %v327_v45, 4  ;;  %v351_v4 = vrot.slane %v350_v59, 2  ;;  %v335_v25 = vrot.slane %v334_v14, 1 }
  0xe0   : > { %v308_v46 = vpop.permute.xlu1 %307 }
  0xe1   : > { %v328_v47 = vmul.f32 %v717_v40, %v308_v46  ;;  %v356_v60 = vadd.f32 %v355_v52, %v327_v45  ;;  %v352_v15 = vadd.f32 %v351_v4, %v350_v59  ;;  %v336_v34 = vadd.f32 %v335_v25, %v334_v14 }
  0xe3   : > { %v361_v53 = vrot.slane %v328_v47, 4  ;;  %v357_v7 = vrot.slane %v356_v60, 2  ;;  %v353_v26 = vrot.slane %v352_v15, 1 }
  0xe4   : > { %v315_v54 = vpop.permute.xlu1 %314 }
  0xe5   : > { %v329_v55 = vmul.f32 %v720_v48, %v315_v54  ;;  %v362_v61 = vadd.f32 %v361_v53, %v328_v47  ;;  %v358_v17 = vadd.f32 %v357_v7, %v356_v60  ;;  %v354_v36 = vadd.f32 %v353_v26, %v352_v15  ;;  %v692_v26 = vld [vmem:[%s1212_s3] ss:$0 sm:$0xff] }
  0xe7   : > { %v367_v62 = vrot.slane %v329_v55, 4  ;;  %v363_v8 = vrot.slane %v362_v61, 2  ;;  %v359_v27 = vrot.slane %v358_v17, 1 }
  0xe8   : > { %v322_v63 = vpop.permute.xlu1 %321 }
  0xe9   : > { %v368_v0 = vadd.f32 %v367_v62, %v329_v55  ;;  %v330_v1 = vmul.f32 %v721_v56, %v322_v63  ;;  %v364_v18 = vadd.f32 %v363_v8, %v362_v61  ;;  %v360_v37 = vadd.f32 %v359_v27, %v358_v17 }
  0xea   : > { %v382_v5 = vpop.xlane.xlu0 %381 }
  0xeb   : > { %v383_v9 = vmax.f32 %v382_v5, 1e-09  ;;  %v373_v10 = vrot.slane %v330_v1, 4  ;;  %v369_v11 = vrot.slane %v368_v0, 2  ;;  %v365_v28 = vrot.slane %v364_v18, 1 }
  0xed   : > { %823 = vrcp.f32 %v383_v9  ;;  %v374_v12 = vadd.f32 %v373_v10, %v330_v1  ;;  %v370_v21 = vadd.f32 %v369_v11, %v368_v0  ;;  %v366_v38 = vadd.f32 %v365_v28, %v364_v18 }
  0xee   : > { %v280_v16 = vpop.permute.xlu0 %279 }
  0xef   : > { %v375_v19 = vrot.slane %v374_v12, 2  ;;  %v324_v20 = vmul.f32 %v709_v6, %v280_v16  ;;  %v371_v30 = vrot.slane %v370_v21, 1 }
  0xf1   : > { %v376_v22 = vadd.f32 %v375_v19, %v374_v12  ;;  %v337_v23 = vrot.slane %v324_v20, 4  ;;  %v372_v40 = vadd.f32 %v371_v30, %v370_v21 }
  0xf3   : > { %v338_v29 = vadd.f32 %v337_v23, %v324_v20  ;;  %v377_v31 = vrot.slane %v376_v22, 1 }
  0xf5   : > { %v339_v32 = vrot.slane %v338_v29, 2  ;;  %v378_v42 = vadd.f32 %v377_v31, %v376_v22 }
  0xf7   : > { %v824_v35 = vpop.eup %823  ;;  %v340_v39 = vadd.f32 %v339_v32, %v338_v29 }
  0xf8   : > { %v392_v41 = vrot.slane %v824_v35, 7  ;;  %v387_v43 = vrot.slane %v824_v35, 2  ;;  %v388_v45 = vrot.slane %v824_v35, 3  ;;  %v389_v46 = vrot.slane %v824_v35, 4 }
  0xf9   : > { %v341_v44 = vrot.slane %v340_v39, 1  ;;  %v390_v47 = vrot.slane %v824_v35, 5  ;;  %v386_v48 = vrot.slane %v824_v35, 1  ;;  %v401_v49 = vmul.f32 %v824_v35, %v336_v34 }
  0xfa   : > { %v391_v50 = vrot.slane %v824_v35, 6  ;;  %v403_v51 = vmul.f32 %v387_v43, %v348_v33  ;;  %v404_v53 = vmul.f32 %v388_v45, %v354_v36  ;;  %v405_v54 = vmul.f32 %v389_v46, %v360_v37 }
  0xfb   : > { %v342_v52 = vadd.f32 %v341_v44, %v340_v39  ;;  %v406_v55 = vmul.f32 %v390_v47, %v366_v38  ;;  %v408_v58 = vmul.f32 %v392_v41, %v378_v42  ;;  %v409_v62 = vpack.c.bf16 %v401_v49, %v401_v49 }
  0xfc   : > { %v407_v56 = vmul.f32 %v391_v50, %v372_v40  ;;  %v411_v57 = vpack.c.bf16 %v403_v51, %v403_v51  ;;  %v412_v60 = vpack.c.bf16 %v404_v53, %v404_v53  ;;  %v413_v61 = vpack.c.bf16 %v405_v54, %v405_v54 }
  0xfd   : > { %v402_v59 = vmul.f32 %v386_v48, %v342_v52  ;;  %v414_v0 = vpack.c.bf16 %v406_v55, %v406_v55  ;;  %v416_v3 = vpack.c.bf16 %v408_v58, %v408_v58  ;;  %v448_v7 = vunpack.c.l.b16 %v409_v62 }
  0xfe   : > { %v415_v1 = vpack.c.bf16 %v407_v56, %v407_v56  ;;  %v450_v2 = vunpack.c.l.b16 %v411_v57  ;;  %v451_v5 = vunpack.c.l.b16 %v412_v60  ;;  %v452_v6 = vunpack.c.l.b16 %v413_v61 }
  0xff   : > { %v410_v63 = vpack.c.bf16 %v402_v59, %v402_v59  ;;  %v453_v9 = vunpack.c.l.b16 %v414_v0  ;;  %v455_v13 = vunpack.c.l.b16 %v416_v3 }
 0x100   : > { %v454_v10 = vunpack.c.l.b16 %v415_v1  ;;  %v459_v11 = vrot.slane %v450_v2, 6  ;;  %v462_v14 = vrot.slane %v451_v5, 5  ;;  %v465_v16 = vrot.slane %v452_v6, 4 }
 0x101   : > { %v449_v4 = vunpack.c.l.b16 %v410_v63  ;;  %v468_v18 = vrot.slane %v453_v9, 3  ;;  %v474_v22 = vrot.slane %v455_v13, 1 }
 0x102   : > { %v471_v20 = vrot.slane %v454_v10, 2 }
 0x103   : > { %v456_v8 = vrot.slane %v449_v4, 7 }
 0x105   : > { %v458_v12 = vsel %vm457_vm2, %v456_v8, %v448_v7 }
 0x106   : > { %v461_v15 = vsel %vm460_vm3, %v459_v11, %v458_v12 }
 0x107   : > { %v464_v17 = vsel %vm463_vm4, %v462_v14, %v461_v15 }
 0x108   : > { %v467_v19 = vsel %vm466_vm5, %v465_v16, %v464_v17 }
 0x109   : > { %v470_v21 = vsel %vm469_vm6, %v468_v18, %v467_v19 }
 0x10a   : > { %v473_v23 = vsel %vm472_vm7, %v471_v20, %v470_v21 }
 0x10b   : > { %v476_v24 = vsel %vm475_vm8, %v474_v22, %v473_v23 }
 0x10c   : > { %v477_v25 = vpack.c.b16 %v476_v24, %v476_v24 }
 0x10e   : > { %751 = vmatmul.mubr.bf16.vlgmr.msra.gmra.mrb[0].mxu0 %v477_v25 }
 0x1e1   : > { %v561_v27 = vpop.f32.mrb[0].mxu0 }
 0x1e2   : > { %v562_v28 = vadd.f32 %v692_v26, %v561_v27  ;;  %v752_v29 = vpop.f32.mrb[1].mxu0 }
 0x1e3   : > { %v564_v30 = vpop.f32.mrb[2].mxu0 }
 0x1e4   : > { %v753_v31 = vpop.f32.mrb[3].mxu0  ;;  %v567_v32 = vmul.f32 %v562_v28, %v562_v28 }
 0x1e6   : > { %568 = vadd.xlane.f32.xlu0 %v567_v32 }
 0x273   : > { %v569_v33 = vpop.xlane.xlu0 %568 }
 0x274   : > { %v570_v34 = vmax.f32 %v569_v33, 1e-24 }
 0x276   : > { %825 = vrsqrt.f32 %v570_v34 }
 0x280   : > { %v826_v35 = vpop.eup %825 }
 0x281   : > { %v572_v36 = vmul.f32 %v826_v35, %v562_v28 }
 0x283   : > { %573 = vst [vmem:[%s243_s26] sm:$0xff] %v572_v36 }
 0x284   : > { %898 = shalt.err (!%p895_p9)
}
 0x285   : > { %s899_s11 = scalar_lea.hbm %s1165_s20, 128  ;;  %s903_s28 = scalar_lea.hbm %s1213_s4, 256 }
 0x286   : > { %p900_p1 = scmp.ne.s32.totalorder %s1165_s20, %s899_s11  ;;  %p904_p11 = scmp.lt.u32.totalorder %s1165_s20, %s1213_s4 }
 0x287   : > { %p905_p2 = scmp.lt.u32.totalorder %s903_s28, %s899_s11  ;;  %p907_p6 = scmp.lt.u32.totalorder %s899_s11, %s1165_s20 }
 0x288   : > { %p901_p0 = pnand %p900_p1, %p1083_p12 }
 0x289   : > { %p906_p4 = por %p905_p2, %p904_p11 }
 0x28a   : > { %p902_p5 = pneg %p901_p0 }
 0x28b   : > { %p908_p8 = por %p907_p6, %p906_p4 }
 0x28d   : > { %p909_p10 = pnand %p908_p8, %p902_p5 }
 0x28f   : > { %912 = shalt.err (!%p909_p10)
}
 0x290   : > { %760 = dma.vmem_to_hbm [thread:$0]  (%p1083_p12), %s1167_s8, 128, %s1165_s20, %s575_s5  }
 0x291 PF: > { %s600_s10 = sand.u32 1, %s943_s15   ;;  %p1228_p13 = scmp.ne.s32.totalorder %s1218_s22, 0 }
 0x292   : > { %p1229_p3 = scmp.ge.s32.totalorder %s955_s18, 2  ;;  %s601_s7 = scalar_lea.sflag [#allocation4], %s600_s10 }
 0x294   : > { %p771_p7 = pnand %p1229_p3, %p1228_p13 }
 0x296   : > { %938 = dma.done.wait (!%p771_p7), %s601_s7, 128  }
 0x297   : > { %940 = vsyncadd (!%p771_p7), %s601_s7, 4294967168  ;;  %p18_p9 = scmp.ge.s32.totalorder %s1045_s27, 4   ;;  %s1230_s15 = smov %s947_s16 }
 0x298   : > { %s1231_s16 = smov %s951_s17  ;;  %s1232_s17 = smov %s1079_s24 }
 0x299   : > { %s1233_s18 = smov %s1045_s27  ;;  %20 = sbr.rel (!%p18_p9) target bundleno = 6 (0x6), region = 88 }
 0x2a0   :  { %606 = vsyncpa [#allocation3], 1 }
 0x2a1   :  { %608 = vsyncpa [#allocation3 + $0x1], 1 }
 0x2a2   :  { %609 = vsyncpa [#allocation6], 1 }
 0x2a3   :  { %610 = vsyncpa [#allocation4], 1 }
 0x2a4   :  { %612 = vsyncpa [#allocation4 + $0x1], 1 }

</bundles_post_ra>
